<compile_context>
chip_gen: v7x
topology: tpu7x:2x2x1
jax: 0.10.0
libtpu: 0.0.40
codegen_flags: <defaults>
</compile_context>

<pallas_src>
import functools

import jax
import jax.numpy as jnp
from jax.experimental import pallas as pl
from jax.experimental.pallas import tpu as pltpu


def _round_up(x: int, m: int) -> int:
    return ((x + m - 1) // m) * m


def _actor_critic_kernel(x_ref, w1_ref, b1_ref, w2_ref, b2_ref,
                         wh_ref, bh_ref, out_ref, *, n_act: int):
    """Fused MLP trunk + (actor softmax | critic Q) heads for one B-tile."""
    x = x_ref[...]

    # trunk: two Linear+ReLU layers (bf16 MXU matmuls, f32 accumulation)
    h1 = jnp.dot(x, w1_ref[...], preferred_element_type=jnp.float32) + b1_ref[...]
    h1 = jnp.maximum(h1, 0.0)
    h2 = jnp.dot(h1.astype(w2_ref.dtype), w2_ref[...],
                 preferred_element_type=jnp.float32) + b2_ref[...]
    h2 = jnp.maximum(h2, 0.0)

    # fused heads: one [tileB, 2A] matmul, then split actor logits / critic Q
    heads = jnp.dot(h2.astype(wh_ref.dtype), wh_ref[...],
                    preferred_element_type=jnp.float32) + bh_ref[...]
    logits = heads[:, :n_act]          # actor logits
    q = heads[:, n_act:]               # critic Q-values

    # numerically-stable softmax; divide routed to EUP via approx reciprocal
    m = jnp.max(logits, axis=-1, keepdims=True)
    e = jnp.exp(logits - m)
    denom = jnp.sum(e, axis=-1, keepdims=True)
    probs = e * pl.reciprocal(denom, approx=True)

    # single lane-denser [tileB, 2A] store
    out_ref[...] = jnp.concatenate([probs, q], axis=-1)


@jax.jit
def actor_critic_forward(states, params):
    """Fused actor-critic forward.  Returns (probs [B,A], q [B,A])."""
    w1, b1, w2, b2, wh, bh = params
    B, D = states.shape
    H = w1.shape[1]
    two_a = wh.shape[1]
    A = two_a // 2

    # Pick a large batch tile (overhead-amortizing); pad B up to a multiple.
    if B <= 512:
        tile_b = _round_up(B, 8)
    else:
        tile_b = 512
    b_pad = _round_up(B, tile_b)

    x = states.astype(jnp.bfloat16)
    if b_pad != B:
        x = jnp.pad(x, ((0, b_pad - B), (0, 0)))

    grid = (b_pad // tile_b,)

    out = pl.pallas_call(
        functools.partial(_actor_critic_kernel, n_act=A),
        out_shape=jax.ShapeDtypeStruct((b_pad, two_a), jnp.float32),
        grid=grid,
        in_specs=[
            # activations: one (tile_b, D) block per grid step
            pl.BlockSpec((tile_b, D), lambda i: (i, 0)),
            # weights/biases: constant block index -> resident across steps
            pl.BlockSpec((D, H), lambda i: (0, 0)),
            pl.BlockSpec((1, H), lambda i: (0, 0)),
            pl.BlockSpec((H, H), lambda i: (0, 0)),
            pl.BlockSpec((1, H), lambda i: (0, 0)),
            pl.BlockSpec((H, two_a), lambda i: (0, 0)),
            pl.BlockSpec((1, two_a), lambda i: (0, 0)),
        ],
        out_specs=pl.BlockSpec((tile_b, two_a), lambda i: (i, 0)),
        compiler_params=pltpu.CompilerParams(
            dimension_semantics=("parallel",)),   # v7x: shard B over 2 TCs
    )(x, w1, b1, w2, b2, wh, bh)

    probs = out[:B, :A]
    q = out[:B, A:]
    return probs, q


class FirstLevelAgent:
    """JAX/Pallas port of First_Level_Agent (forward/sample_action only)."""
    # TODO(synk): save()/load()/time_stamp() are host-side torch I/O with no
    # Pallas equivalent; omitted.

    def __init__(self, n_actions: int, state_dim: int, hidden: int,
                 noop_action: bool, key):
        self._n_actions = n_actions + int(noop_action)
        self._noop = noop_action
        self._id = "pallas_agent"

        D, H, A = state_dim, hidden, self._n_actions
        ks = jax.random.split(key, 8)
        scale = lambda fan_in: 1.0 / jnp.sqrt(jnp.float32(fan_in))
        w1 = jax.random.normal(ks[0], (D, H), jnp.float32) * scale(D)
        b1 = jax.random.normal(ks[1], (1, H), jnp.float32) * 0.01
        w2 = jax.random.normal(ks[2], (H, H), jnp.float32) * scale(H)
        b2 = jax.random.normal(ks[3], (1, H), jnp.float32) * 0.01
        wa = jax.random.normal(ks[4], (H, A), jnp.float32) * scale(H)
        ba = jax.random.normal(ks[5], (1, A), jnp.float32) * 0.01
        wc = jax.random.normal(ks[6], (H, A), jnp.float32) * scale(H)
        bc = jax.random.normal(ks[7], (1, A), jnp.float32) * 0.01

        # fused actor|critic head weights; bf16 weights, f32 biases
        wh = jnp.concatenate([wa, wc], axis=1)
        bh = jnp.concatenate([ba, bc], axis=1)
        self.params = (
            w1.astype(jnp.bfloat16), b1,
            w2.astype(jnp.bfloat16), b2,
            wh.astype(jnp.bfloat16), bh,
        )

    def forward(self, states):
        # PyTorch forward() is `pass`; expose the network forward instead.
        if states.ndim == 1:
            states = states[None, :]
        return actor_critic_forward(states, self.params)

    def sample_action(self, state, explore=True, use_actor=True, eps=0.0,
                      key=None):
        if state.ndim == 1:
            state = state[None, :]
        probs, q = actor_critic_forward(state, self.params)
        if use_actor:
            dist = probs
            if explore:
                if key is None:
                    key = jax.random.PRNGKey(0)
                action = jax.random.categorical(key, jnp.log(probs + 1e-20),
                                                axis=-1)
            else:
                action = jnp.argmax(probs, axis=-1)
        else:
            dist = q
            greedy = jnp.argmax(q, axis=-1)
            if explore and eps > 0.0:
                if key is None:
                    key = jax.random.PRNGKey(0)
                kr, ku = jax.random.split(key)
                rand_a = jax.random.randint(kr, greedy.shape, 0,
                                            self._n_actions)
                take_rand = jax.random.uniform(ku, greedy.shape) < eps
                action = jnp.where(take_rand, rand_a, greedy)
            else:
                action = greedy
        return action, dist

    def get_id(self):
        return self._id


if __name__ == "__main__":
    key = jax.random.PRNGKey(0)
    k_param, k_state = jax.random.split(key)

    B, D, H = 8, 32, 64          # batch, state_dim, hidden
    n_actions, noop = 7, True    # -> 8 discrete actions
    A = n_actions + int(noop)

    agent = FirstLevelAgent(n_actions, D, H, noop, k_param)
    states = jax.random.normal(k_state, (B, D), jnp.float32)

    # deterministic (greedy) actor path
    action, dist = agent.sample_action(states, explore=False, use_actor=True)
    action = jax.block_until_ready(action)
    dist = jax.block_until_ready(dist)
    assert action.shape == (B,)
    assert dist.shape == (B, A)
    # actor distribution rows must sum to ~1 (approx reciprocal: ~1e-3 tol)
    assert bool(jnp.all(jnp.abs(jnp.sum(dist, axis=-1) - 1.0) < 5e-3))

    # critic (greedy Q) path
    action_q, q = agent.sample_action(states, explore=False, use_actor=False)
    action_q = jax.block_until_ready(action_q)
    q = jax.block_until_ready(q)
    assert action_q.shape == (B,)
    assert q.shape == (B, A)

    print("KERNEL_OK")
</pallas_src>

<mosaic_0001>
module attributes {stable_mosaic.version = 11 : i64} {
  func.func @_actor_critic_kernel(%arg0: i32, %arg1: memref<8x32xbf16, #tpu.memory_space<vmem>>, %arg2: memref<32x64xbf16, #tpu.memory_space<vmem>>, %arg3: memref<1x64xf32, #tpu.memory_space<vmem>>, %arg4: memref<64x64xbf16, #tpu.memory_space<vmem>>, %arg5: memref<1x64xf32, #tpu.memory_space<vmem>>, %arg6: memref<64x16xbf16, #tpu.memory_space<vmem>>, %arg7: memref<1x16xf32, #tpu.memory_space<vmem>>, %arg8: memref<8x16xf32, #tpu.memory_space<vmem>>) attributes {dimension_semantics = [#tpu.dimension_semantics<parallel>], iteration_bounds = array<i64: 1>, scalar_prefetch = 0 : i64, scratch_operands = 0 : i64, tpu.core_type = #tpu.core_type<tc>, window_params = [{transform_indices = @transform_0, window_bounds = array<i64: 8, 32>}, {pipeline_mode = #tpu.pipeline_mode<synchronous>, transform_indices = @transform_1, window_bounds = array<i64: 32, 64>}, {pipeline_mode = #tpu.pipeline_mode<synchronous>, transform_indices = @transform_2, window_bounds = array<i64: 1, 64>}, {pipeline_mode = #tpu.pipeline_mode<synchronous>, transform_indices = @transform_3, window_bounds = array<i64: 64, 64>}, {pipeline_mode = #tpu.pipeline_mode<synchronous>, transform_indices = @transform_4, window_bounds = array<i64: 1, 64>}, {pipeline_mode = #tpu.pipeline_mode<synchronous>, transform_indices = @transform_5, window_bounds = array<i64: 64, 16>}, {pipeline_mode = #tpu.pipeline_mode<synchronous>, transform_indices = @transform_6, window_bounds = array<i64: 1, 16>}, {transform_indices = @transform_7, window_bounds = array<i64: 8, 16>}]} {
    %c0 = arith.constant 0 : index
    %c0_0 = arith.constant 0 : index
    %0 = vector.load %arg1[%c0, %c0_0] : memref<8x32xbf16, #tpu.memory_space<vmem>>, vector<8x32xbf16>
    %c0_1 = arith.constant 0 : index
    %c0_2 = arith.constant 0 : index
    %1 = vector.load %arg2[%c0_1, %c0_2] : memref<32x64xbf16, #tpu.memory_space<vmem>>, vector<32x64xbf16>
    %cst = arith.constant dense<0.000000e+00> : vector<8x64xf32>
    %2 = tpu.matmul %0, %1, %cst {dimension_numbers = #tpu.dot_dimension_numbers<[1], [0], [0], [1], [0, 0, 1, 1], [], []>} : vector<8x32xbf16>, vector<32x64xbf16>, vector<8x64xf32> -> vector<8x64xf32>
    %c0_3 = arith.constant 0 : index
    %c0_4 = arith.constant 0 : index
    %3 = vector.load %arg3[%c0_3, %c0_4] : memref<1x64xf32, #tpu.memory_space<vmem>>, vector<1x64xf32>
    %4 = vector.broadcast %3 : vector<1x64xf32> to vector<8x64xf32>
    %5 = arith.addf %2, %4 : vector<8x64xf32>
    %cst_5 = arith.constant 0.000000e+00 : f32
    %6 = vector.broadcast %cst_5 : f32 to vector<8x64xf32>
    %7 = arith.maximumf %5, %6 : vector<8x64xf32>
    %8 = arith.truncf %7 : vector<8x64xf32> to vector<8x64xbf16>
    %c0_6 = arith.constant 0 : index
    %c0_7 = arith.constant 0 : index
    %9 = vector.load %arg4[%c0_6, %c0_7] : memref<64x64xbf16, #tpu.memory_space<vmem>>, vector<64x64xbf16>
    %cst_8 = arith.constant dense<0.000000e+00> : vector<8x64xf32>
    %10 = tpu.matmul %8, %9, %cst_8 {dimension_numbers = #tpu.dot_dimension_numbers<[1], [0], [0], [1], [0, 0, 1, 1], [], []>} : vector<8x64xbf16>, vector<64x64xbf16>, vector<8x64xf32> -> vector<8x64xf32>
    %c0_9 = arith.constant 0 : index
    %c0_10 = arith.constant 0 : index
    %11 = vector.load %arg5[%c0_9, %c0_10] : memref<1x64xf32, #tpu.memory_space<vmem>>, vector<1x64xf32>
    %12 = vector.broadcast %11 : vector<1x64xf32> to vector<8x64xf32>
    %13 = arith.addf %10, %12 : vector<8x64xf32>
    %cst_11 = arith.constant 0.000000e+00 : f32
    %14 = vector.broadcast %cst_11 : f32 to vector<8x64xf32>
    %15 = arith.maximumf %13, %14 : vector<8x64xf32>
    %16 = arith.truncf %15 : vector<8x64xf32> to vector<8x64xbf16>
    %c0_12 = arith.constant 0 : index
    %c0_13 = arith.constant 0 : index
    %17 = vector.load %arg6[%c0_12, %c0_13] : memref<64x16xbf16, #tpu.memory_space<vmem>>, vector<64x16xbf16>
    %cst_14 = arith.constant dense<0.000000e+00> : vector<8x16xf32>
    %18 = tpu.matmul %16, %17, %cst_14 {dimension_numbers = #tpu.dot_dimension_numbers<[1], [0], [0], [1], [0, 0, 1, 1], [], []>} : vector<8x64xbf16>, vector<64x16xbf16>, vector<8x16xf32> -> vector<8x16xf32>
    %c0_15 = arith.constant 0 : index
    %c0_16 = arith.constant 0 : index
    %19 = vector.load %arg7[%c0_15, %c0_16] : memref<1x16xf32, #tpu.memory_space<vmem>>, vector<1x16xf32>
    %20 = vector.broadcast %19 : vector<1x16xf32> to vector<8x16xf32>
    %21 = arith.addf %18, %20 : vector<8x16xf32>
    %22 = vector.extract_strided_slice %21 {offsets = [0, 0], sizes = [8, 8], strides = [1, 1]} : vector<8x16xf32> to vector<8x8xf32>
    %23 = vector.extract_strided_slice %21 {offsets = [0, 8], sizes = [8, 8], strides = [1, 1]} : vector<8x16xf32> to vector<8x8xf32>
    %cst_17 = arith.constant dense<0xFF800000> : vector<8xf32>
    %24 = vector.multi_reduction <maximumf>, %22, %cst_17 [1] : vector<8x8xf32> to vector<8xf32>
    %25 = vector.shape_cast %24 : vector<8xf32> to vector<8x1xf32>
    %26 = vector.broadcast %25 : vector<8x1xf32> to vector<8x8xf32>
    %27 = arith.subf %22, %26 : vector<8x8xf32>
    %28 = math.exp %27 : vector<8x8xf32>
    %cst_18 = arith.constant dense<0.000000e+00> : vector<8xf32>
    %29 = vector.multi_reduction <add>, %28, %cst_18 [1] : vector<8x8xf32> to vector<8xf32>
    %30 = vector.shape_cast %29 : vector<8xf32> to vector<8x1xf32>
    %31 = tpu.reciprocal %30 {approx = true} : vector<8x1xf32> -> vector<8x1xf32>
    %32 = vector.broadcast %31 : vector<8x1xf32> to vector<8x8xf32>
    %33 = arith.mulf %28, %32 : vector<8x8xf32>
    %34 = tpu.concatenate %33, %23 in 1 : vector<8x8xf32>, vector<8x8xf32> -> vector<8x16xf32>
    %c0_19 = arith.constant 0 : index
    %c0_20 = arith.constant 0 : index
    %35 = vector.load %arg8[%c0_19, %c0_20] : memref<8x16xf32, #tpu.memory_space<vmem>>, vector<8x16xf32>
    tpu.vector_store %arg8[%c0_19, %c0_20], %34 {strides = array<i32>} : memref<8x16xf32, #tpu.memory_space<vmem>>, vector<8x16xf32>,
    return
  }
  func.func @transform_0(%arg0: i32) -> (i32, i32) {
    %c0_i32 = arith.constant 0 : i32
    %c0_i32_0 = arith.constant 0 : i32
    return %arg0, %c0_i32 : i32, i32
  }
  func.func @transform_1(%arg0: i32) -> (i32, i32) {
    %c0_i32 = arith.constant 0 : i32
    %c0_i32_0 = arith.constant 0 : i32
    %c0_i32_1 = arith.constant 0 : i32
    return %c0_i32, %c0_i32_0 : i32, i32
  }
  func.func @transform_2(%arg0: i32) -> (i32, i32) {
    %c0_i32 = arith.constant 0 : i32
    %c0_i32_0 = arith.constant 0 : i32
    %c0_i32_1 = arith.constant 0 : i32
    return %c0_i32, %c0_i32_0 : i32, i32
  }
  func.func @transform_3(%arg0: i32) -> (i32, i32) {
    %c0_i32 = arith.constant 0 : i32
    %c0_i32_0 = arith.constant 0 : i32
    %c0_i32_1 = arith.constant 0 : i32
    return %c0_i32, %c0_i32_0 : i32, i32
  }
  func.func @transform_4(%arg0: i32) -> (i32, i32) {
    %c0_i32 = arith.constant 0 : i32
    %c0_i32_0 = arith.constant 0 : i32
    %c0_i32_1 = arith.constant 0 : i32
    return %c0_i32, %c0_i32_0 : i32, i32
  }
  func.func @transform_5(%arg0: i32) -> (i32, i32) {
    %c0_i32 = arith.constant 0 : i32
    %c0_i32_0 = arith.constant 0 : i32
    %c0_i32_1 = arith.constant 0 : i32
    return %c0_i32, %c0_i32_0 : i32, i32
  }
  func.func @transform_6(%arg0: i32) -> (i32, i32) {
    %c0_i32 = arith.constant 0 : i32
    %c0_i32_0 = arith.constant 0 : i32
    %c0_i32_1 = arith.constant 0 : i32
    return %c0_i32, %c0_i32_0 : i32, i32
  }
  func.func @transform_7(%arg0: i32) -> (i32, i32) {
    %c0_i32 = arith.constant 0 : i32
    %c0_i32_0 = arith.constant 0 : i32
    return %arg0, %c0_i32 : i32, i32
  }
}

</mosaic_0001>

<bundles_post_ra>
// kernel: actor_critic_forward.1
= control target key start
LH: loop header
LB: loop body
LE: loop exit
PB: predicated region body
PF: predicated region fallthrough
CT: control target
= control target key end

     0   :  { %v360_v0 = vmov 0.0   ;;  %vm361_vm0 = vmmov 0   ;;  %vm51_vm1 = vcmask 261120   ;;  %vm136_vm2 = vcmask 523264   ;;  %s455_s1 = inlined_call_operand.vmem [shape: bf16[32,64], index: 1, kind: input, shape index: {}]   ;;  %s456_s3 = inlined_call_operand.vmem [shape: bf16[64,64], index: 3, kind: input, shape index: {}]   ;;  %s457_s0 = inlined_call_operand.vmem [shape: bf16[8,32], index: 0, kind: input, shape index: {}]   ;;  %s458_s5 = inlined_call_operand.vmem [shape: bf16[64,16], index: 5, kind: input, shape index: {}]   ;;  %s459_s2 = inlined_call_operand.vmem [shape: f32[1,64], index: 2, kind: input, shape index: {}]   ;;  %s460_s4 = inlined_call_operand.vmem [shape: f32[1,64], index: 4, kind: input, shape index: {}]   ;;  %s461_s6 = inlined_call_operand.vmem [shape: f32[1,16], index: 6, kind: input, shape index: {}]   ;;  %s462_s7 = inlined_call_operand.vmem [shape: f32[8,16], index: 7, kind: output, shape index: {}]  }
   0x1   :  { %312 = vmatprep.subr.bf16.mxu0 %v360_v0  ;;  %v346_v1 = vld [vmem:[%s455_s1] sm:$0xff]   ;;  %316 = vmatprep.mubr.msk.bf16.mxu0 %vm361_vm0, %v360_v0  ;;  %v347_v2 = vld [vmem:[%s455_s1 + $0x8] sm:$0xff]   ;;  %v350_v6 = vld [vmem:[%s456_s3 + $0x10] sm:$0xff]   ;;  %vm264_vm3 = vcmask 64512   ;;  %vm277_vm4 = vcmask 130048  }
   0x2   :  { %320 = vmatprep.subr.bf16.mxu1 %v360_v0  ;;  %328 = vmatprep.mubr.msk.bf16.mxu1 %vm361_vm0, %v360_v0  ;;  %v348_v3 = vld [vmem:[%s456_s3] sm:$0xff]   ;;  %v349_v4 = vld [vmem:[%s456_s3 + $0x8] sm:$0xff]   ;;  %v351_v7 = vld [vmem:[%s456_s3 + $0x18] sm:$0xff]  }
   0x3   :  { %313 = vmatpush3.bf16.msra.mxu0 %v346_v1  ;;  %321 = vmatpush3.bf16.msra.mxu1 %v348_v3  ;;  %v27_v5 = vld [vmem:[%s457_s0] sm:$0xf]  ;;  %v353_v9 = vld [vmem:[%s458_s5 + $0x8] sm:$0xff]   ;;  %v354_v18 = vld [vmem:[%s458_s5 + $0x10] sm:$0xff]  }
   0x4   :  { %314 = vmatprep.subr.bf16.mxu0 %v360_v0  ;;  %322 = vmatprep.subr.bf16.mxu1 %v360_v0  ;;  %v352_v8 = vld [vmem:[%s458_s5] sm:$0xff]   ;;  %v355_v19 = vld [vmem:[%s458_s5 + $0x18] sm:$0xff]  }
   0x5   :  { %v283_v10 = vld [vmem:[%s459_s2] ss:$0 sm:$0xff] }
   0x6   :  { %v287_v20 = vld [vmem:[%s460_s4] ss:$0 sm:$0xff] }
   0x7   :  { %315 = vmatpush3.bf16.msra.mxu0 %v347_v2  ;;  %323 = vmatpush3.bf16.msra.mxu1 %v349_v4  ;;  %v293_v28 = vld [vmem:[%s461_s6] ss:$0 sm:$0xff] }
   0x8   :  { %332 = vmatprep.subr.bf16.mxu0 %v360_v0  ;;  %324 = vmatprep.subr.bf16.mxu1 %v360_v0 }
   0xa   :  { %317 = vmatmul.mubr.msk.bf16.vlgmr.msra.gmra.mrb[0].mxu0 %vm51_vm1, %v27_v5 }
   0xb   :  { %340 = vmatprep.mubr.msk.bf16.mxu0 %vm361_vm0, %v360_v0  ;;  %325 = vmatpush3.bf16.msra.mxu1 %v350_v6 }
   0xc   :  { %326 = vmatprep.subr.bf16.mxu1 %v360_v0  ;;  %333 = vmatpush3.bf16.msra.mxu0 %v352_v8 }
   0xd   :  { %334 = vmatprep.subr.bf16.mxu0 %v360_v0 }
   0xf   :  { %327 = vmatpush3.bf16.msra.mxu1 %v351_v7 }
  0x10   :  { %335 = vmatpush3.bf16.msra.mxu0 %v353_v9 }
  0x11   :  { %336 = vmatprep.subr.bf16.mxu0 %v360_v0 }
  0x14   :  { %337 = vmatpush3.bf16.msra.mxu0 %v354_v18 }
  0x15   :  { %338 = vmatprep.subr.bf16.mxu0 %v360_v0 }
  0x18   :  { %339 = vmatpush3.bf16.msra.mxu0 %v355_v19 }
  0xdd   :  { %v89_v11 = vpop.f32.mrb[0].mxu0 }
  0xde   :  { %v90_v12 = vadd.f32 %v283_v10, %v89_v11  ;;  %v318_v13 = vpop.f32.mrb[1].mxu0 }
  0xdf   :  { %v92_v14 = vpop.f32.mrb[2].mxu0 }
  0xe0   :  { %v95_v15 = vmax.f32 %v90_v12, 0.0  ;;  %v319_v16 = vpop.f32.mrb[3].mxu0 }
  0xe2   :  { %v96_v17 = vpack.c.bf16 %v95_v15, %v95_v15 }
  0xe4   :  { %329 = vmatmul.mubr.msk.bf16.vlgmr.msra.gmra.mrb[0].mxu1 %vm136_vm2, %v96_v17 }
 0x1b7   :  { %v174_v21 = vpop.f32.mrb[0].mxu1 }
 0x1b8   :  { %v175_v22 = vadd.f32 %v287_v20, %v174_v21  ;;  %v330_v23 = vpop.f32.mrb[1].mxu1 }
 0x1b9   :  { %v177_v24 = vpop.f32.mrb[2].mxu1 }
 0x1ba   :  { %v180_v25 = vmax.f32 %v175_v22, 0.0  ;;  %v331_v26 = vpop.f32.mrb[3].mxu1 }
 0x1bc   :  { %v181_v27 = vpack.c.bf16 %v180_v25, %v180_v25 }
 0x1be   :  { %341 = vmatmul.mubr.msk.bf16.vlgmr.msra.gmra.mrb[4].mxu0 %vm136_vm2, %v181_v27 }
 0x291   :  { %v258_v29 = vpop.f32.mrb[4].mxu0 }
 0x292   :  { %v259_v30 = vadd.f32 %v293_v28, %v258_v29  ;;  %v342_v31 = vpop.f32.mrb[5].mxu0 }
 0x293   :  { %v261_v32 = vpop.f32.mrb[6].mxu0 }
 0x294   :  { %v343_v33 = vpop.f32.mrb[7].mxu0  ;;  %v265_v34 = vsel %vm264_vm3, %v259_v30, -inf }
 0x295   :  { %266 = vmax.xlane.f32.xlu0 %v265_v34 }
 0x322   :  { %v267_v35 = vpop.xlane.xlu0 %266 }
 0x323   :  { %v268_v36 = vsub.f32 %v259_v30, %v267_v35 }
 0x325   :  { %v269_v37 = vmul.f32 1.442695, %v268_v36 }
 0x327   :  { %356 = vpow2.f32 %v269_v37 }
 0x331   :  { %v357_v38 = vpop.eup %356 }
 0x332   :  { %v271_v39 = vsel %vm264_vm3, %v357_v38, 0.0 }
 0x333   :  { %272 = vadd.xlane.f32.xlu0 %v271_v39 }
 0x3c0   :  { %v273_v40 = vpop.xlane.xlu0 %272 }
 0x3c1   :  { %358 = vrcp.f32 %v273_v40 }
 0x3cb   :  { %v359_v41 = vpop.eup %358 }
 0x3cc   :  { %v275_v42 = vmul.f32 %v359_v41, %v357_v38 }
 0x3ce   :  { %v276_v43 = vsel %vm264_vm3, %v275_v42, %v259_v30 }
 0x3cf   :  { %278 = vst.msk [vmem:[%s462_s7] sm:$0xff] %vm277_vm4, %v276_v43 }

</bundles_post_ra>
